<compile_context>
chip_gen: v5e
topology: v5e:2x2
jax: 0.10.0
libtpu: 0.0.40
codegen_flags: <defaults>
</compile_context>

<pallas_src>
import functools

import jax
import jax.numpy as jnp
from jax.experimental import pallas as pl
from jax.experimental.pallas import tpu as pltpu

D_IN, D_H1, D_H2, D_OUT = 572, 120, 84, 2
LANE = 128          # padded width of every layer output
DEFAULT_TB = 512    # batch tile: multiple of 256 (v6e/v7x MXU) and of 128 (v5e)


def _round_up(n, m):
    return ((n + m - 1) // m) * m


def phynet_kernel(x_ref, w1_ref, b1_ref, w2_ref, b2_ref, w3_ref, b3_ref, o_ref):
    # fc1 + ReLU: bf16 MXU matmul, f32 accumulation, f32 epilogue.
    h1 = jnp.dot(x_ref[...], w1_ref[...], preferred_element_type=jnp.float32)
    h1 = jnp.maximum(h1 + b1_ref[...], 0.0)
    # fc2 + ReLU (cast only the MXU operand back to bf16; epilogue stays f32).
    h2 = jnp.dot(h1.astype(jnp.bfloat16), w2_ref[...],
                 preferred_element_type=jnp.float32)
    h2 = jnp.maximum(h2 + b2_ref[...], 0.0)
    # fc3 (no activation). Output is a lane-dense (TB, 128) padded slab.
    h3 = jnp.dot(h2.astype(jnp.bfloat16), w3_ref[...],
                 preferred_element_type=jnp.float32)
    o_ref[...] = (h3 + b3_ref[...]).astype(o_ref.dtype)


def prepare_params(params):
    """Pad every layer's output dim to 128 lanes; weights -> bf16, biases -> f32."""
    w1, b1, w2, b2, w3, b3 = params

    def pad_w(w, rows, cols):
        return jnp.pad(
            w, ((0, rows - w.shape[0]), (0, cols - w.shape[1]))
        ).astype(jnp.bfloat16)

    def pad_b(b, cols):
        return jnp.pad(b, ((0, 0), (0, cols - b.shape[1]))).astype(jnp.float32)

    return (pad_w(w1, D_IN, LANE), pad_b(b1, LANE),
            pad_w(w2, LANE, LANE), pad_b(b2, LANE),
            pad_w(w3, LANE, LANE), pad_b(b3, LANE))


@functools.partial(jax.jit, static_argnames=("tb",))
def phynet_forward(x, padded_params, tb=DEFAULT_TB):
    w1, b1, w2, b2, w3, b3 = padded_params
    B = x.shape[0]

    # Shrink the tile for tiny batches; pad B up to a multiple of the tile.
    tb = min(tb, _round_up(B, 8))
    Bp = _round_up(B, tb)
    x = jnp.pad(x, ((0, Bp - B), (0, 0))).astype(jnp.bfloat16)

    resident = lambda shape: pl.BlockSpec(shape, lambda i: (0, 0))

    out = pl.pallas_call(
        phynet_kernel,
        out_shape=jax.ShapeDtypeStruct((Bp, LANE), jnp.float32),
        grid_spec=pltpu.PrefetchScalarGridSpec(
            num_scalar_prefetch=0,
            grid=(Bp // tb,),
            in_specs=[
                pl.BlockSpec((tb, D_IN), lambda i: (i, 0)),   # x tile (pipelined)
                resident((D_IN, LANE)), resident((1, LANE)),  # w1, b1 (resident)
                resident((LANE, LANE)), resident((1, LANE)),  # w2, b2
                resident((LANE, LANE)), resident((1, LANE)),  # w3, b3
            ],
            out_specs=pl.BlockSpec((tb, LANE), lambda i: (i, 0)),
        ),
        compiler_params=pltpu.CompilerParams(
            dimension_semantics=("parallel",)),   # shards batch steps on v7x's 2 TCs
    )(x, w1, b1, w2, b2, w3, b3)

    return out[:B, :D_OUT]


def init_params(key):
    # Deterministic init mimicking nn.Linear's U(-1/sqrt(fan_in), 1/sqrt(fan_in)).
    dims = [(D_IN, D_H1), (D_H1, D_H2), (D_H2, D_OUT)]
    params = []
    for i, (fan_in, fan_out) in enumerate(dims):
        kw, kb = jax.random.split(jax.random.fold_in(key, i))
        bound = 1.0 / jnp.sqrt(float(fan_in))
        w = jax.random.uniform(kw, (fan_in, fan_out), jnp.float32, -bound, bound)
        b = jax.random.uniform(kb, (1, fan_out), jnp.float32, -bound, bound)
        params += [w, b]
    return tuple(params)


def _ref_f32(x, params):
    w1, b1, w2, b2, w3, b3 = params
    h = jnp.maximum(x @ w1 + b1, 0.0)
    h = jnp.maximum(h @ w2 + b2, 0.0)
    return h @ w3 + b3


def _ref_bf16(x, params):
    # Mirrors the kernel arithmetic: bf16 MXU operands, f32 accumulation/epilogue.
    w1, b1, w2, b2, w3, b3 = params
    bf = jnp.bfloat16
    h = jnp.maximum(jnp.dot(x.astype(bf), w1.astype(bf),
                            preferred_element_type=jnp.float32) + b1, 0.0)
    h = jnp.maximum(jnp.dot(h.astype(bf), w2.astype(bf),
                            preferred_element_type=jnp.float32) + b2, 0.0)
    return jnp.dot(h.astype(bf), w3.astype(bf),
                   preferred_element_type=jnp.float32) + b3


if __name__ == "__main__":
    key = jax.random.PRNGKey(0)
    kx, kp = jax.random.split(key)
    params = init_params(kp)
    padded = prepare_params(params)

    # Small batch (single grid step).
    B = 8
    x = jax.random.normal(kx, (B, D_IN), dtype=jnp.float32)
    out = phynet_forward(x, padded)
    jax.block_until_ready(out)
    assert out.shape == (B, D_OUT)
    assert jnp.allclose(out, _ref_bf16(x, params), atol=1e-2, rtol=1e-2)
    assert jnp.allclose(out, _ref_f32(x, params), atol=5e-2, rtol=5e-2)

    # Larger, non-divisible batch (exercises padding + multi-step pipelined grid).
    B2 = 1100
    x2 = jax.random.normal(jax.random.fold_in(kx, 1), (B2, D_IN), dtype=jnp.float32)
    out2 = phynet_forward(x2, padded)
    jax.block_until_ready(out2)
    assert out2.shape == (B2, D_OUT)
    assert jnp.allclose(out2, _ref_bf16(x2, params), atol=1e-2, rtol=1e-2)
    assert jnp.allclose(out2, _ref_f32(x2, params), atol=5e-2, rtol=5e-2)

    print("KERNEL_OK")
</pallas_src>

<mosaic_0001>
module attributes {stable_mosaic.version = 11 : i64} {
  func.func @phynet_kernel(%arg0: i32, %arg1: memref<8x572xbf16, #tpu.memory_space<vmem>>, %arg2: memref<572x128xbf16, #tpu.memory_space<vmem>>, %arg3: memref<1x128xf32, #tpu.memory_space<vmem>>, %arg4: memref<128x128xbf16, #tpu.memory_space<vmem>>, %arg5: memref<1x128xf32, #tpu.memory_space<vmem>>, %arg6: memref<128x128xbf16, #tpu.memory_space<vmem>>, %arg7: memref<1x128xf32, #tpu.memory_space<vmem>>, %arg8: memref<8x128xf32, #tpu.memory_space<vmem>>) attributes {dimension_semantics = [#tpu.dimension_semantics<parallel>], iteration_bounds = array<i64: 1>, scalar_prefetch = 0 : i64, scratch_operands = 0 : i64, tpu.core_type = #tpu.core_type<tc>, window_params = [{transform_indices = @transform_0, window_bounds = array<i64: 8, 572>}, {pipeline_mode = #tpu.pipeline_mode<synchronous>, transform_indices = @transform_1, window_bounds = array<i64: 572, 128>}, {pipeline_mode = #tpu.pipeline_mode<synchronous>, transform_indices = @transform_2, window_bounds = array<i64: 1, 128>}, {pipeline_mode = #tpu.pipeline_mode<synchronous>, transform_indices = @transform_3, window_bounds = array<i64: 128, 128>}, {pipeline_mode = #tpu.pipeline_mode<synchronous>, transform_indices = @transform_4, window_bounds = array<i64: 1, 128>}, {pipeline_mode = #tpu.pipeline_mode<synchronous>, transform_indices = @transform_5, window_bounds = array<i64: 128, 128>}, {pipeline_mode = #tpu.pipeline_mode<synchronous>, transform_indices = @transform_6, window_bounds = array<i64: 1, 128>}, {transform_indices = @transform_7, window_bounds = array<i64: 8, 128>}]} {
    %c0 = arith.constant 0 : index
    %c0_0 = arith.constant 0 : index
    %0 = vector.load %arg1[%c0, %c0_0] : memref<8x572xbf16, #tpu.memory_space<vmem>>, vector<8x572xbf16>
    %c0_1 = arith.constant 0 : index
    %c0_2 = arith.constant 0 : index
    %1 = vector.load %arg2[%c0_1, %c0_2] : memref<572x128xbf16, #tpu.memory_space<vmem>>, vector<572x128xbf16>
    %cst = arith.constant dense<0.000000e+00> : vector<8x128xf32>
    %2 = tpu.matmul %0, %1, %cst {dimension_numbers = #tpu.dot_dimension_numbers<[1], [0], [0], [1], [0, 0, 1, 1], [], []>} : vector<8x572xbf16>, vector<572x128xbf16>, vector<8x128xf32> -> vector<8x128xf32>
    %c0_3 = arith.constant 0 : index
    %c0_4 = arith.constant 0 : index
    %3 = vector.load %arg3[%c0_3, %c0_4] : memref<1x128xf32, #tpu.memory_space<vmem>>, vector<1x128xf32>
    %4 = vector.broadcast %3 : vector<1x128xf32> to vector<8x128xf32>
    %5 = arith.addf %2, %4 : vector<8x128xf32>
    %cst_5 = arith.constant 0.000000e+00 : f32
    %6 = vector.broadcast %cst_5 : f32 to vector<8x128xf32>
    %7 = arith.maximumf %5, %6 : vector<8x128xf32>
    %8 = arith.truncf %7 : vector<8x128xf32> to vector<8x128xbf16>
    %c0_6 = arith.constant 0 : index
    %c0_7 = arith.constant 0 : index
    %9 = vector.load %arg4[%c0_6, %c0_7] : memref<128x128xbf16, #tpu.memory_space<vmem>>, vector<128x128xbf16>
    %cst_8 = arith.constant dense<0.000000e+00> : vector<8x128xf32>
    %10 = tpu.matmul %8, %9, %cst_8 {dimension_numbers = #tpu.dot_dimension_numbers<[1], [0], [0], [1], [0, 0, 1, 1], [], []>} : vector<8x128xbf16>, vector<128x128xbf16>, vector<8x128xf32> -> vector<8x128xf32>
    %c0_9 = arith.constant 0 : index
    %c0_10 = arith.constant 0 : index
    %11 = vector.load %arg5[%c0_9, %c0_10] : memref<1x128xf32, #tpu.memory_space<vmem>>, vector<1x128xf32>
    %12 = vector.broadcast %11 : vector<1x128xf32> to vector<8x128xf32>
    %13 = arith.addf %10, %12 : vector<8x128xf32>
    %cst_11 = arith.constant 0.000000e+00 : f32
    %14 = vector.broadcast %cst_11 : f32 to vector<8x128xf32>
    %15 = arith.maximumf %13, %14 : vector<8x128xf32>
    %16 = arith.truncf %15 : vector<8x128xf32> to vector<8x128xbf16>
    %c0_12 = arith.constant 0 : index
    %c0_13 = arith.constant 0 : index
    %17 = vector.load %arg6[%c0_12, %c0_13] : memref<128x128xbf16, #tpu.memory_space<vmem>>, vector<128x128xbf16>
    %cst_14 = arith.constant dense<0.000000e+00> : vector<8x128xf32>
    %18 = tpu.matmul %16, %17, %cst_14 {dimension_numbers = #tpu.dot_dimension_numbers<[1], [0], [0], [1], [0, 0, 1, 1], [], []>} : vector<8x128xbf16>, vector<128x128xbf16>, vector<8x128xf32> -> vector<8x128xf32>
    %c0_15 = arith.constant 0 : index
    %c0_16 = arith.constant 0 : index
    %19 = vector.load %arg7[%c0_15, %c0_16] : memref<1x128xf32, #tpu.memory_space<vmem>>, vector<1x128xf32>
    %20 = vector.broadcast %19 : vector<1x128xf32> to vector<8x128xf32>
    %21 = arith.addf %18, %20 : vector<8x128xf32>
    %c0_17 = arith.constant 0 : index
    %c0_18 = arith.constant 0 : index
    %22 = vector.load %arg8[%c0_17, %c0_18] : memref<8x128xf32, #tpu.memory_space<vmem>>, vector<8x128xf32>
    tpu.vector_store %arg8[%c0_17, %c0_18], %21 {strides = array<i32>} : memref<8x128xf32, #tpu.memory_space<vmem>>, vector<8x128xf32>,
    return
  }
  func.func @transform_0(%arg0: i32) -> (i32, i32) {
    %c0_i32 = arith.constant 0 : i32
    %c0_i32_0 = arith.constant 0 : i32
    return %arg0, %c0_i32 : i32, i32
  }
  func.func @transform_1(%arg0: i32) -> (i32, i32) {
    %c0_i32 = arith.constant 0 : i32
    %c0_i32_0 = arith.constant 0 : i32
    %c0_i32_1 = arith.constant 0 : i32
    return %c0_i32, %c0_i32_0 : i32, i32
  }
  func.func @transform_2(%arg0: i32) -> (i32, i32) {
    %c0_i32 = arith.constant 0 : i32
    %c0_i32_0 = arith.constant 0 : i32
    %c0_i32_1 = arith.constant 0 : i32
    return %c0_i32, %c0_i32_0 : i32, i32
  }
  func.func @transform_3(%arg0: i32) -> (i32, i32) {
    %c0_i32 = arith.constant 0 : i32
    %c0_i32_0 = arith.constant 0 : i32
    %c0_i32_1 = arith.constant 0 : i32
    return %c0_i32, %c0_i32_0 : i32, i32
  }
  func.func @transform_4(%arg0: i32) -> (i32, i32) {
    %c0_i32 = arith.constant 0 : i32
    %c0_i32_0 = arith.constant 0 : i32
    %c0_i32_1 = arith.constant 0 : i32
    return %c0_i32, %c0_i32_0 : i32, i32
  }
  func.func @transform_5(%arg0: i32) -> (i32, i32) {
    %c0_i32 = arith.constant 0 : i32
    %c0_i32_0 = arith.constant 0 : i32
    %c0_i32_1 = arith.constant 0 : i32
    return %c0_i32, %c0_i32_0 : i32, i32
  }
  func.func @transform_6(%arg0: i32) -> (i32, i32) {
    %c0_i32 = arith.constant 0 : i32
    %c0_i32_0 = arith.constant 0 : i32
    %c0_i32_1 = arith.constant 0 : i32
    return %c0_i32, %c0_i32_0 : i32, i32
  }
  func.func @transform_7(%arg0: i32) -> (i32, i32) {
    %c0_i32 = arith.constant 0 : i32
    %c0_i32_0 = arith.constant 0 : i32
    return %arg0, %c0_i32 : i32, i32
  }
}

</mosaic_0001>

<bundles_post_ra>
// kernel: phynet_forward.1
= control target key start
LH: loop header
LB: loop body
LE: loop exit
PB: predicated region body
PF: predicated region fallthrough
CT: control target
= control target key end

     0   :  { %12 = vsyncpa [#allocation3], 0  ;;  %s1113_s0 = inlined_call_operand.vmem [shape: bf16[8,572], index: 0, kind: input, shape index: {}]   ;;  %s1114_s1 = inlined_call_operand.hbm [shape: bf16[572,128], index: 1, kind: input, shape index: {}]   ;;  %s1115_s2 = inlined_call_operand.hbm [shape: f32[1,128], index: 2, kind: input, shape index: {}]   ;;  %s1116_s3 = inlined_call_operand.hbm [shape: bf16[128,128], index: 3, kind: input, shape index: {}]   ;;  %s1117_s4 = inlined_call_operand.hbm [shape: f32[1,128], index: 4, kind: input, shape index: {}]   ;;  %s1118_s5 = inlined_call_operand.vmem [shape: bf16[128,128], index: 5, kind: input, shape index: {}]   ;;  %s1119_s6 = inlined_call_operand.vmem [shape: f32[1,128], index: 6, kind: input, shape index: {}]   ;;  %s1120_s7 = inlined_call_operand.vmem [shape: f32[8,128], index: 7, kind: output, shape index: {}]  }
   0x1   :  { %13 = vsyncpa [#allocation5], 0  ;;  %s35_s26 = sshll.u32 %s1115_s2, 4  ;;  %s36_s26 = int_to_ptr.hbm [resolvable:$true] %s35_s26 }
   0x2   :  { %14 = vsyncpa [#allocation8], 0  ;;  %s1016_s27 = smov [#allocation4]   ;;  %s21_s8 = sshll.u32 %s1114_s1, 4  ;;  %s22_s8 = int_to_ptr.hbm [resolvable:$true] %s21_s8 }
   0x3   :  { %s37_s28 = sshll.u32 %s1016_s27, 4  ;;  %s1017_s9 = smov [#allocation2]   ;;  %s38_s28 = int_to_ptr.vmem [resolvable:$true] %s37_s28 }
   0x4   :  { %40 = dma.hbm_to_vmem [thread:$0]  %s36_s26, 16, %s38_s28, [#allocation5]  }
   0x5   :  { %s23_s10 = sshll.u32 %s1017_s9, 4  ;;  %s1018_s11 = smov 64   ;;  %s24_s10 = int_to_ptr.vmem [resolvable:$true] %s23_s10 }
   0x6   :  { %s1019_s12 = smov 4   ;;  %s45_s2 = sshll.u32 %s1116_s3, 4  ;;  %s46_s2 = int_to_ptr.hbm [resolvable:$true] %s45_s2 }
   0x7   :  { %29 = dma.hbm_to_vmem [thread:$0]  %s22_s8, 4608, %s24_s10, [#allocation3], %s1018_s11, %s1018_s11, %s1019_s12  }
   0x8   :  { %s1020_s15 = smov [#allocation6]   ;;  %s59_s1 = sshll.u32 %s1117_s4, 4  ;;  %s60_s1 = int_to_ptr.hbm [resolvable:$true] %s59_s1 }
   0x9   :  { %s47_s16 = sshll.u32 %s1020_s15, 4  ;;  %s1021_s19 = smov [#allocation7]   ;;  %s48_s16 = int_to_ptr.vmem [resolvable:$true] %s47_s16 }
   0xa   :  { %53 = dma.hbm_to_vmem [thread:$0]  %s46_s2, 1024, %s48_s16, [#allocation5], %s1018_s11, %s1018_s11, %s1019_s12  }
   0xb   :  { %s61_s20 = sshll.u32 %s1021_s19, 4  ;;  %s62_s20 = int_to_ptr.vmem [resolvable:$true] %s61_s20 }
   0xc   :  { %64 = dma.hbm_to_vmem [thread:$0]  %s60_s1, 16, %s62_s20, [#allocation8]  }
   0xd   :  { %1010 = dma.done.wait [#allocation3], 4608  }
   0xe   :  { %1011 = vsyncadd [#allocation3], 4294962688 }
   0xf   :  { %1012 = dma.done.wait [#allocation5], 1040  }
  0x10   :  { %1013 = vsyncadd [#allocation5], 4294966256 }
  0x11   :  { %1014 = dma.done.wait [#allocation8], 16  }
  0x12   :  { %1015 = vsyncadd [#allocation8], 4294967280  ;;  %v860_v0 = vld [vmem:[#allocation2 + $0x38] sm:$0xff]  ;;  %v859_v4 = vld [vmem:[#allocation2 + $0x30] sm:$0xff]  ;;  %vm401_vm0 = vcmask 1045504   ;;  %vm397_vm1 = vcmask 490496  }
  0x13   :  { %v876_v1 = vld [vmem:[#allocation2 + $0xb8] sm:$0xff]  ;;  %405 = vmatpush.bf16.msra.mxu0 %v860_v0  ;;  %v875_v5 = vld [vmem:[#allocation2 + $0xb0] sm:$0xff]  ;;  %v858_v8 = vld [vmem:[#allocation2 + $0x28] sm:$0xff] }
  0x14   :  { %v884_v2 = vld [vmem:[#allocation2 + $0xf8] sm:$0xff]  ;;  %431 = vmatpush.bf16.msra.mxu2 %v876_v1  ;;  %v883_v6 = vld [vmem:[#allocation2 + $0xf0] sm:$0xff]  ;;  %v874_v9 = vld [vmem:[#allocation2 + $0xa8] sm:$0xff] }
  0x15   :  { %v868_v3 = vld [vmem:[#allocation2 + $0x78] sm:$0xff]  ;;  %444 = vmatpush.bf16.msra.mxu3 %v884_v2  ;;  %v867_v7 = vld [vmem:[#allocation2 + $0x70] sm:$0xff]  ;;  %v882_v10 = vld [vmem:[#allocation2 + $0xe8] sm:$0xff] }
  0x16   :  { %418 = vmatpush.bf16.msra.mxu1 %v868_v3  ;;  %v866_v11 = vld [vmem:[#allocation2 + $0x68] sm:$0xff]  ;;  %v857_v12 = vld [vmem:[#allocation2 + $0x20] sm:$0xff]  ;;  %v856_v16 = vld [vmem:[#allocation2 + $0x18] sm:$0xff] }
  0x17   :  { %406 = vmatpush.bf16.msra.mxu0 %v859_v4  ;;  %v873_v13 = vld [vmem:[#allocation2 + $0xa0] sm:$0xff]  ;;  %v872_v17 = vld [vmem:[#allocation2 + $0x98] sm:$0xff]  ;;  %v855_v20 = vld [vmem:[#allocation2 + $0x10] sm:$0xff] }
  0x18   :  { %432 = vmatpush.bf16.msra.mxu2 %v875_v5  ;;  %v881_v14 = vld [vmem:[#allocation2 + $0xe0] sm:$0xff]  ;;  %v880_v18 = vld [vmem:[#allocation2 + $0xd8] sm:$0xff]  ;;  %v871_v21 = vld [vmem:[#allocation2 + $0x90] sm:$0xff] }
  0x19   :  { %445 = vmatpush.bf16.msra.mxu3 %v883_v6  ;;  %v865_v15 = vld [vmem:[#allocation2 + $0x60] sm:$0xff]  ;;  %v864_v19 = vld [vmem:[#allocation2 + $0x58] sm:$0xff]  ;;  %v879_v22 = vld [vmem:[#allocation2 + $0xd0] sm:$0xff] }
  0x1a   :  { %419 = vmatpush.bf16.msra.mxu1 %v867_v7  ;;  %v863_v23 = vld [vmem:[#allocation2 + $0x50] sm:$0xff]  ;;  %v854_v24 = vld [vmem:[#allocation2 + $0x8] sm:$0xff]  ;;  %v86_v26 = vld [vmem:[%s1113_s0] sm:$0xff] }
  0x1b   :  { %407 = vmatpush.bf16.msra.mxu0 %v858_v8  ;;  %v870_v25 = vld [vmem:[#allocation2 + $0x88] sm:$0xff]  ;;  %v786_v28 = vld [vmem:[#allocation2 + $0x118] sm:$0xf]  ;;  %v888_v29 = vld [vmem:[#allocation2 + $0x118] sm:$0x30]  ;;  %v168_v32 = vunpack.c.l.b16 %v86_v26  ;;  %v169_v38 = vunpack.c.h.b16 %v86_v26 }
  0x1c   :  { %433 = vmatpush.bf16.msra.mxu2 %v874_v9  ;;  %v87_v27 = vld [vmem:[%s1113_s0 + $0x8] sm:$0xff]  ;;  %v787_v34 = vor.u32 %v888_v29, %v786_v28  ;;  %v853_v35 = vld [vmem:[#allocation2] sm:$0xff]  ;;  %v887_v47 = vld [vmem:[#allocation2 + $0x110] sm:$0xff] }
  0x1d   :  { %446 = vmatpush.bf16.msra.mxu3 %v882_v10  ;;  %v878_v30 = vld [vmem:[#allocation2 + $0xc8] sm:$0xff]  ;;  %v170_v33 = vunpack.c.l.b16 %v87_v27  ;;  %v869_v36 = vld [vmem:[#allocation2 + $0x80] sm:$0xff]  ;;  %v171_v37 = vunpack.c.h.b16 %v87_v27  ;;  %v173_v42 = vpack.c.b16 %v168_v32, %v168_v32  ;;  %v174_v46 = vpack.c.b16 %v169_v38, %v169_v38  ;;  %v895_v48 = vld [vmem:[#allocation6 + $0x30] sm:$0xff] }
  0x1e   :  { %420 = vmatpush.bf16.msra.mxu1 %v866_v11  ;;  %v862_v31 = vld [vmem:[#allocation2 + $0x48] sm:$0xff]  ;;  %v877_v39 = vld [vmem:[#allocation2 + $0xc0] sm:$0xff]  ;;  %v403_v44 = vsel %vm401_vm0, %v787_v34, 0  ;;  %v88_v50 = vld [vmem:[%s1113_s0 + $0x10] sm:$0xf] }
  0x1f   :  { %408 = vmatpush.bf16.msra.mxu0 %v857_v12  ;;  %v861_v40 = vld [vmem:[#allocation2 + $0x40] sm:$0xff]  ;;  %v175_v43 = vpack.c.b16 %v170_v33, %v170_v33  ;;  %v176_v45 = vpack.c.b16 %v171_v37, %v171_v37  ;;  %v886_v49 = vld [vmem:[#allocation2 + $0x108] sm:$0xff]  ;;  %v172_v52 = vunpack.c.l.b16 %v88_v50  ;;  %v891_v57 = vld [vmem:[#allocation6 + $0x10] sm:$0xff] }
  0x20   :  { %434 = vmatpush.bf16.msra.mxu2 %v873_v13  ;;  %v896_v41 = vld [vmem:[#allocation6 + $0x38] sm:$0xff]  ;;  %v894_v54 = vld [vmem:[#allocation6 + $0x28] sm:$0xff]  ;;  %v893_v55 = vld [vmem:[#allocation6 + $0x20] sm:$0xff] }
  0x21   :  { %447 = vmatpush.bf16.msra.mxu3 %v881_v14  ;;  %v885_v51 = vld [vmem:[#allocation2 + $0x100] sm:$0xff]  ;;  %v177_v53 = vpack.c.b16 %v172_v52, %v172_v52  ;;  %v890_v58 = vld [vmem:[#allocation6 + $0x8] sm:$0xff]  ;;  %v904_v60 = vld [vmem:[%s1118_s5 + $0x38] sm:$0xff] }
  0x22   :  { %421 = vmatpush.bf16.msra.mxu1 %v865_v15  ;;  %v892_v56 = vld [vmem:[#allocation6 + $0x18] sm:$0xff]  ;;  %v889_v59 = vld [vmem:[#allocation6] sm:$0xff]  ;;  %v903_v61 = vld [vmem:[%s1118_s5 + $0x30] sm:$0xff] }
  0x23   :  { %409 = vmatpush.bf16.msra.mxu0 %v856_v16  ;;  %v902_v62 = vld [vmem:[%s1118_s5 + $0x28] sm:$0xff]  ;;  %v911_v0 = vld [vmem:[#allocation4] ss:$0 sm:$0xff]  ;;  %v900_v5 = vld [vmem:[%s1118_s5 + $0x18] sm:$0xff] }
  0x24   :  { %435 = vmatpush.bf16.msra.mxu2 %v872_v17  ;;  %v901_v2 = vld [vmem:[%s1118_s5 + $0x20] sm:$0xff]  ;;  %v899_v10 = vld [vmem:[%s1118_s5 + $0x10] sm:$0xff] }
  0x25   :  { %448 = vmatpush.bf16.msra.mxu3 %v880_v18  ;;  %v913_v28 = vld [vmem:[%s1119_s6] ss:$0 sm:$0xff] }
  0x26   :  { %422 = vmatpush.bf16.msra.mxu1 %v864_v19 }
  0x27   :  { %410 = vmatpush.bf16.msra.mxu0 %v855_v20  ;;  %v898_v20 = vld [vmem:[%s1118_s5 + $0x8] sm:$0xff] }
  0x28   :  { %436 = vmatpush.bf16.msra.mxu2 %v871_v21  ;;  %v897_v21 = vld [vmem:[%s1118_s5] sm:$0xff] }
  0x29   :  { %449 = vmatpush.bf16.msra.mxu3 %v879_v22  ;;  %v912_v22 = vld [vmem:[#allocation7] ss:$0 sm:$0xff] }
  0x2a   :  { %423 = vmatpush.bf16.msra.mxu1 %v863_v23 }
  0x2b   :  { %411 = vmatpush.bf16.msra.mxu0 %v854_v24 }
  0x2c   :  { %437 = vmatpush.bf16.msra.mxu2 %v870_v25 }
  0x2d   :  { %450 = vmatpush.bf16.msra.mxu3 %v878_v30 }
  0x2e   :  { %424 = vmatpush.bf16.msra.mxu1 %v862_v31 }
  0x2f   :  { %412 = vmatpush.bf16.msra.mxu0 %v853_v35 }
  0x30   :  { %438 = vmatpush.bf16.msra.mxu2 %v869_v36 }
  0x31   :  { %451 = vmatpush.bf16.msra.mxu3 %v877_v39 }
  0x32   :  { %425 = vmatpush.bf16.msra.mxu1 %v861_v40  ;;  %413 = vmatmul.bf16.vlgmr.msra.gmra.mxu0 %v173_v42 }
  0x33   :  { %461 = vmatpush.bf16.msrb.mxu0 %v403_v44  ;;  %439 = vmatmul.bf16.vlgmr.msra.gmra.mxu2 %v175_v43 }
  0x34   :  { %452 = vmatmul.bf16.vlgmr.msra.gmra.mxu3 %v176_v45  ;;  %623 = vmatpush.bf16.msrb.mxu2 %v904_v60 }
  0x35   :  { %426 = vmatmul.bf16.vlgmr.msra.gmra.mxu1 %v174_v46 }
  0x36   :  { %540 = vmatpush.bf16.msrb.mxu1 %v896_v41 }
  0x37   :  { %462 = vmatpush.bf16.msrb.mxu0 %v887_v47 }
  0x38   :  { %624 = vmatpush.bf16.msrb.mxu2 %v903_v61 }
  0x3a   :  { %541 = vmatpush.bf16.msrb.mxu1 %v895_v48 }
  0x3b   :  { %463 = vmatpush.bf16.msrb.mxu0 %v886_v49 }
  0x3c   :  { %625 = vmatpush.bf16.msrb.mxu2 %v902_v62 }
  0x3e   :  { %542 = vmatpush.bf16.msrb.mxu1 %v894_v54 }
  0x3f   :  { %464 = vmatpush.bf16.msrb.mxu0 %v885_v51 }
  0x40   :  { %626 = vmatpush.bf16.msrb.mxu2 %v901_v2 }
  0x42   :  { %788 = vmatmul.msk.bf16.vlgmr.msrb.gmra.mxu0 %vm397_vm1, %v177_v53  ;;  %543 = vmatpush.bf16.msrb.mxu1 %v893_v55 }
  0x44   :  { %627 = vmatpush.bf16.msrb.mxu2 %v900_v5 }
  0x46   :  { %544 = vmatpush.bf16.msrb.mxu1 %v892_v56 }
  0x48   :  { %628 = vmatpush.bf16.msrb.mxu2 %v899_v10 }
  0x4a   :  { %545 = vmatpush.bf16.msrb.mxu1 %v891_v57 }
  0x4c   :  { %629 = vmatpush.bf16.msrb.mxu2 %v898_v20 }
  0x4e   :  { %546 = vmatpush.bf16.msrb.mxu1 %v890_v58 }
  0x50   :  { %630 = vmatpush.bf16.msrb.mxu2 %v897_v21 }
  0x52   :  { %547 = vmatpush.bf16.msrb.mxu1 %v889_v59 }
  0xaf   :  { %v414_v63 = vpop.f32.mrf.mxu0 }
  0xb0   :  { %v415_v3 = vadd.f32 %v911_v0, %v414_v63 }
  0xb2   :  { %v427_v1 = vpop.f32.mrf.mxu1 }
  0xb3   :  { %v428_v8 = vadd.f32 %v427_v1, %v415_v3 }
  0xb6   :  { %v440_v4 = vpop.f32.mrf.mxu2 }
  0xb7   :  { %v453_v6 = vpop.f32.mrf.mxu3  ;;  %v416_v7 = vpop.f32.mrf.mxu0  ;;  %v441_v11 = vadd.f32 %v440_v4, %v428_v8 }
  0xb9   :  { %v454_v13 = vadd.f32 %v453_v6, %v441_v11 }
  0xba   :  { %v429_v9 = vpop.f32.mrf.mxu1 }
  0xbe   :  { %v442_v12 = vpop.f32.mrf.mxu2 }
  0xbf   :  { %v455_v14 = vpop.f32.mrf.mxu3  ;;  %v466_v15 = vpop.f32.mrf.mxu0 }
  0xc0   :  { %v467_v16 = vadd.f32 %v466_v15, %v454_v13 }
  0xc2   :  { %v470_v17 = vmax.f32 %v467_v16, 0.0 }
  0xc4   :  { %v471_v18 = vpack.c.bf16 %v470_v17, %v470_v17 }
  0xc6   :  { %548 = vmatmul.bf16.vlgmr.msrb.gmra.mxu1 %v471_v18 }
  0xc7   :  { %v468_v19 = vpop.f32.mrf.mxu0 }
 0x143   :  { %v549_v23 = vpop.f32.mrf.mxu1 }
 0x144   :  { %v550_v24 = vadd.f32 %v912_v22, %v549_v23 }
 0x146   :  { %v553_v25 = vmax.f32 %v550_v24, 0.0 }
 0x148   :  { %v554_v26 = vpack.c.bf16 %v553_v25, %v553_v25 }
 0x14a   :  { %631 = vmatmul.bf16.vlgmr.msrb.gmra.mxu2 %v554_v26 }
 0x14b   :  { %v551_v27 = vpop.f32.mrf.mxu1 }
 0x1cd   :  { %v632_v29 = vpop.f32.mrf.mxu2 }
 0x1ce   :  { %v633_v30 = vadd.f32 %v913_v28, %v632_v29 }
 0x1d0   :  { %636 = vst [vmem:[%s1120_s7] sm:$0xff] %v633_v30 }
 0x1d5   :  { %v634_v31 = vpop.f32.mrf.mxu2 }
 0x1d6   :  { %641 = vsyncpa [#allocation3], 1 }
 0x1d7   :  { %642 = vsyncpa [#allocation5], 1 }
 0x1d8   :  { %643 = vsyncpa [#allocation8], 1 }

</bundles_post_ra>
